<compile_context>
chip_gen: v6e
topology: v6e:2x2x1
jax: 0.10.0
libtpu: 0.0.40
codegen_flags: <defaults>
</compile_context>

<pallas_src>
import functools

import jax
import jax.numpy as jnp
from jax import lax
from jax.experimental import pallas as pl
from jax.experimental.pallas import tpu as pltpu


def _ml_attention_kernel(x_ref, wv_ref, len_ref, scores_ref, out_ref, *scratch,
                         ns):
    """One (batch-tile, seq-chunk) grid step.

    Grid: (num_batch_tiles, ns); the seq-chunk axis is innermost ("arbitrary").

    x_ref:      (ts, tb, H)  x dtype   -- native (seq, batch, hidden) slice
    wv_ref:     (1, H)       f32       -- folded projection vector  W_w @ W_v
    len_ref:    (tb, 1)      i32       -- source lengths
    scores_ref: (tb, S)      out dtype -- resident across the seq-chunk axis
    out_ref:    (tb, H)      out dtype -- resident across the seq-chunk axis
    scratch (only when ns > 1): m (1,tb), l (1,tb), acc (tb,H), raw (S,tb) f32
    """
    si = pl.program_id(1)
    ts, tb, H = x_ref.shape

    x = x_ref[...].astype(jnp.float32)                          # (ts, tb, H)

    # Folded projection (softmax-invariant bias dropped): raw[s,b] = x[s,b,:].wv
    raw = jnp.sum(x * wv_ref[...].reshape(1, 1, H), axis=-1)    # (ts, tb)

    # Source-length mask.  A large finite negative (not -inf): identical output
    # for any row with >=1 valid position (exp underflows to exactly 0), and a
    # zero-length row degrades to uniform weights instead of PyTorch's NaNs.
    seq_idx = si * ts + lax.broadcasted_iota(jnp.int32, (ts, tb), 0)
    lens = jnp.transpose(len_ref[...])                          # (tb,1) -> (1,tb)
    raw = jnp.where(seq_idx < lens, raw, jnp.float32(-1e30))

    if ns == 1:
        # Whole sequence in one block: plain masked softmax (fast path).
        m = jnp.max(raw, axis=0, keepdims=True)                 # (1, tb)
        e = jnp.exp(raw - m)                                    # (ts, tb)
        l = jnp.sum(e, axis=0, keepdims=True)                   # (1, tb)
        w = e / l                                               # (ts, tb)
        scores_ref[...] = jnp.transpose(w).astype(scores_ref.dtype)
        out_ref[...] = jnp.sum(x * w[:, :, None], axis=0).astype(out_ref.dtype)
        return

    # ---- sequence-tiled path: online softmax over the "arbitrary" axis ----
    m_scr, l_scr, acc_scr, raw_scr = scratch

    @pl.when(si == 0)
    def _init():
        m_scr[...] = jnp.full_like(m_scr, -1e30)
        l_scr[...] = jnp.zeros_like(l_scr)
        acc_scr[...] = jnp.zeros_like(acc_scr)

    # Stash the masked logits (sublane-offset store, no lane realignment) so the
    # final normalized scores can be produced in one shot at the end.
    off = pl.multiple_of(si * ts, ts)
    raw_scr[pl.ds(off, ts), :] = raw

    m_prev = m_scr[...]                                         # (1, tb)
    m_new = jnp.maximum(m_prev, jnp.max(raw, axis=0, keepdims=True))
    alpha = jnp.exp(m_prev - m_new)                             # (1, tb)
    p = jnp.exp(raw - m_new)                                    # (ts, tb)
    l_scr[...] = alpha * l_scr[...] + jnp.sum(p, axis=0, keepdims=True)
    acc_scr[...] = (jnp.transpose(alpha) * acc_scr[...]
                    + jnp.sum(x * p[:, :, None], axis=0))       # (tb, H)
    m_scr[...] = m_new

    @pl.when(si == ns - 1)
    def _finalize():
        m = m_scr[...]                                          # (1, tb)
        l = l_scr[...]                                          # (1, tb)
        w_all = jnp.exp(raw_scr[...] - m) / l                   # (S, tb)
        scores_ref[...] = jnp.transpose(w_all).astype(scores_ref.dtype)
        out_ref[...] = (acc_scr[...] / jnp.transpose(l)).astype(out_ref.dtype)


def _round_up(x, m):
    return -(-x // m) * m


def _vmem_budget():
    """(tile-picker budget, vmem_limit_bytes), generation aware, safe fallback."""
    cap = None
    try:
        info_fn = getattr(pltpu, "get_tpu_info", None)
        if info_fn is not None:
            cap = getattr(info_fn(), "vmem_capacity_bytes", None)
    except Exception:
        cap = None
    if cap is not None and cap >= 100 * 1024 * 1024:       # v5e / v6e: 128 MiB VMEM
        return 64 * 1024 * 1024, 100 * 1024 * 1024
    return 24 * 1024 * 1024, 48 * 1024 * 1024              # v7x (64 MiB) / unknown


def _choose_tiles(S, B, H, x_itemsize, budget_bytes):
    """Pick (batch_tile, seq_tile) that honour the VMEM budget.

    batch_tile is B or a multiple of 8 (second-to-last-dim tiling rule); it is
    capped near ceil(B/2) when B >= 16 so the "parallel" batch axis has >= 2
    grid steps (megacore).  seq_tile always divides S so the sequence axis
    never sees padded (potentially garbage) rows.
    """
    if B >= 16:
        cap = _round_up(_round_up(B, 2) // 2, 8)            # ceil(B/2) -> mult of 8
        tb_list = list(range(cap, 7, -8))
    else:
        tb_list = [B] + [t for t in range((B // 8) * 8, 7, -8) if t != B]
    ts_list = [d for d in range(S, 0, -1) if S % d == 0]

    def footprint(tb, ts):
        # Resident per batch tile: scores/attn output blocks + acc/raw scratch.
        resident = 3 * tb * S * 4 + 3 * tb * H * 4 + 64 * tb
        # Per grid step: double-buffered x block + f32 upcast / elementwise temps.
        per_step = (2 * ts * tb * H * x_itemsize
                    + 2 * ts * tb * H * 4
                    + 8 * ts * tb * 4)
        return resident + per_step

    # Prefer the whole sequence in one block (fewest steps, simplest pipeline).
    for tb in tb_list:
        if footprint(tb, S) <= budget_bytes:
            return tb, S
    # Otherwise tile the sequence (online softmax), preferring long chunks.
    for ts in ts_list:
        for tb in tb_list:
            if footprint(tb, ts) <= budget_bytes:
                return tb, ts
    return tb_list[-1], ts_list[-1]                         # degenerate: best effort


def ml_attention(x_sbh, x_lengths, w_hid_attn, b_attn, v_attn, *,
                 batch_tile=None, seq_tile=None):
    """x_sbh: (S, B, H) in the module's native layout; x_lengths: (B,) ints.

    w_hid_attn = proj_w.weight.T (H, A);  b_attn = proj_w.bias (A,) [its
    contribution is softmax-invariant, so it is unused];  v_attn =
    proj_v.weight[0] (A,).  Returns (scores (B, S), attn_x (B, H)) in x.dtype.
    """
    del b_attn  # (b . v) shifts all unmasked logits equally -> softmax-invariant
    S, B, H = x_sbh.shape
    out_dtype = x_sbh.dtype

    # Fold the two linears (no nonlinearity between them): x @ (W @ v).
    wv = (w_hid_attn.astype(jnp.float32) @ v_attn.astype(jnp.float32)).reshape(1, H)
    lens = x_lengths.astype(jnp.int32).reshape(B, 1)

    budget, vmem_limit = _vmem_budget()
    tb, ts = _choose_tiles(S, B, H, jnp.dtype(x_sbh.dtype).itemsize, budget)
    if batch_tile is not None:
        tb = batch_tile
    if seq_tile is not None:
        ts = seq_tile
    assert ts >= 1 and S % ts == 0, "seq_tile must divide seq_len"
    assert tb == B or tb % 8 == 0, "batch_tile must be B or a multiple of 8"
    ns = S // ts
    grid = (pl.cdiv(B, tb), ns)

    scratch = []
    if ns > 1:
        scratch = [
            pltpu.VMEM((1, tb), jnp.float32),    # running max   m
            pltpu.VMEM((1, tb), jnp.float32),    # running sum   l
            pltpu.VMEM((tb, H), jnp.float32),    # unnormalized attention accum
            pltpu.VMEM((S, tb), jnp.float32),    # masked logits (final scores)
        ]

    kernel = functools.partial(_ml_attention_kernel, ns=ns)

    scores, attn_x = pl.pallas_call(
        kernel,
        out_shape=(jax.ShapeDtypeStruct((B, S), out_dtype),
                   jax.ShapeDtypeStruct((B, H), out_dtype)),
        grid=grid,
        in_specs=[
            pl.BlockSpec((ts, tb, H), lambda bi, si: (si, bi, 0)),   # x (native)
            pl.BlockSpec((1, H), lambda bi, si: (0, 0)),             # folded W @ v
            pl.BlockSpec((tb, 1), lambda bi, si: (bi, 0)),           # lengths
        ],
        out_specs=(pl.BlockSpec((tb, S), lambda bi, si: (bi, 0)),    # scores
                   pl.BlockSpec((tb, H), lambda bi, si: (bi, 0))),   # attn_x
        scratch_shapes=scratch,
        compiler_params=pltpu.CompilerParams(
            dimension_semantics=("parallel", "arbitrary"),
            vmem_limit_bytes=vmem_limit,
        ),
    )(x_sbh, wv, lens)
    return scores, attn_x


def _reference(x_sbh, x_lengths, w, b, v):
    """Pure-JAX reference mirroring the PyTorch forward (two-stage projection)."""
    S, B, H = x_sbh.shape
    flat = x_sbh.reshape(-1, H).astype(jnp.float32)
    mlp = flat @ w.astype(jnp.float32) + b.astype(jnp.float32)       # (S*B, A)
    att = (mlp @ v.astype(jnp.float32)[:, None]).reshape(S, B).T     # (B, S)
    idx = jnp.arange(S)[None, :]
    att = jnp.where(idx < x_lengths[:, None], att, -jnp.inf)
    scores = jax.nn.softmax(att, axis=-1)                            # (B, S)
    attn_x = jnp.sum(x_sbh.astype(jnp.float32) * scores.T[:, :, None], axis=0)
    return scores.astype(x_sbh.dtype), attn_x.astype(x_sbh.dtype)


if __name__ == "__main__":
    key = jax.random.PRNGKey(0)

    def make_case(k, S, B, H, A):
        kx, kl, kw, kb, kv = jax.random.split(k, 5)
        x = jax.random.normal(kx, (S, B, H), dtype=jnp.float32)
        lengths = jax.random.randint(kl, (B,), 1, S + 1, dtype=jnp.int32)
        bound_w = 1.0 / (H ** 0.5)
        bound_v = 1.0 / (A ** 0.5)
        # proj_w.weight is (A, H) in torch; we store its transpose (H, A).
        w = jax.random.uniform(kw, (H, A), jnp.float32, -bound_w, bound_w)
        b = jax.random.uniform(kb, (A,), jnp.float32, -bound_w, bound_w)
        # proj_v.weight is (1, A); stored as (A,).
        v = jax.random.uniform(kv, (A,), jnp.float32, -bound_v, bound_v)
        return x, lengths, w, b, v

    k1, k2 = jax.random.split(key)

    # Case 1: module-sized shapes, single-block fast path.
    x, lengths, w, b, v = make_case(k1, S=8, B=2, H=32, A=16)
    lengths = jnp.array([5, 8], dtype=jnp.int32)
    scores, attn_x = ml_attention(x, lengths, w, b, v)
    jax.block_until_ready((scores, attn_x))
    ref_s, ref_a = _reference(x, lengths, w, b, v)
    assert scores.shape == (2, 8) and attn_x.shape == (2, 32)
    # Folding W and v reorders the FP summation -> allow ~1e-4 tolerance.
    assert jnp.allclose(scores, ref_s, atol=1e-4, rtol=1e-4)
    assert jnp.allclose(attn_x, ref_a, atol=1e-4, rtol=1e-4)

    # Case 2: force batch + sequence tiling (online-softmax path, padded last
    # batch tile) to exercise the large-shape code path at a small size.
    x2, lengths2, w2, b2, v2 = make_case(k2, S=16, B=12, H=32, A=16)
    scores2, attn2 = ml_attention(x2, lengths2, w2, b2, v2,
                                  batch_tile=8, seq_tile=8)
    jax.block_until_ready((scores2, attn2))
    ref_s2, ref_a2 = _reference(x2, lengths2, w2, b2, v2)
    assert jnp.allclose(scores2, ref_s2, atol=1e-4, rtol=1e-4)
    assert jnp.allclose(attn2, ref_a2, atol=1e-4, rtol=1e-4)

    print("KERNEL_OK")
</pallas_src>

<mosaic_0001>
module attributes {stable_mosaic.version = 11 : i64} {
  func.func @_ml_attention_kernel(%arg0: i32, %arg1: i32, %arg2: memref<8x2x32xf32, #tpu.memory_space<vmem>>, %arg3: memref<1x32xf32, #tpu.memory_space<vmem>>, %arg4: memref<2x1xi32, #tpu.memory_space<vmem>>, %arg5: memref<2x8xf32, #tpu.memory_space<vmem>>, %arg6: memref<2x32xf32, #tpu.memory_space<vmem>>) attributes {dimension_semantics = [#tpu.dimension_semantics<parallel>, #tpu.dimension_semantics<arbitrary>], iteration_bounds = array<i64: 1, 1>, scalar_prefetch = 0 : i64, scratch_operands = 0 : i64, tpu.core_type = #tpu.core_type<tc>, window_params = [{transform_indices = @transform_0, window_bounds = array<i64: 8, 2, 32>}, {pipeline_mode = #tpu.pipeline_mode<synchronous>, transform_indices = @transform_1, window_bounds = array<i64: 1, 32>}, {transform_indices = @transform_2, window_bounds = array<i64: 2, 1>}, {transform_indices = @transform_3, window_bounds = array<i64: 2, 8>}, {transform_indices = @transform_4, window_bounds = array<i64: 2, 32>}]} {
    %c0 = arith.constant 0 : index
    %c0_0 = arith.constant 0 : index
    %c0_1 = arith.constant 0 : index
    %0 = vector.load %arg2[%c0, %c0_0, %c0_1] : memref<8x2x32xf32, #tpu.memory_space<vmem>>, vector<8x2x32xf32>
    %c0_2 = arith.constant 0 : index
    %c0_3 = arith.constant 0 : index
    %1 = vector.load %arg3[%c0_2, %c0_3] : memref<1x32xf32, #tpu.memory_space<vmem>>, vector<1x32xf32>
    %2 = vector.shape_cast %1 : vector<1x32xf32> to vector<1x1x32xf32>
    %3 = vector.broadcast %2 : vector<1x1x32xf32> to vector<8x2x32xf32>
    %4 = arith.mulf %0, %3 : vector<8x2x32xf32>
    %cst = arith.constant dense<0.000000e+00> : vector<8x2xf32>
    %5 = vector.multi_reduction <add>, %4, %cst [2] : vector<8x2x32xf32> to vector<8x2xf32>
    %c8_i32 = arith.constant 8 : i32
    %6 = arith.muli %arg1, %c8_i32 : i32
    %7 = tpu.iota {dimensions = array<i32: 0>} : vector<8x2xi32>
    %8 = vector.broadcast %6 : i32 to vector<8x2xi32>
    %9 = arith.addi %8, %7 : vector<8x2xi32>
    %c0_4 = arith.constant 0 : index
    %c0_5 = arith.constant 0 : index
    %10 = vector.load %arg4[%c0_4, %c0_5] : memref<2x1xi32, #tpu.memory_space<vmem>>, vector<2x1xi32>
    %11 = tpu.transpose %10, [1, 0] : vector<2x1xi32> -> vector<1x2xi32>
    %12 = vector.broadcast %11 : vector<1x2xi32> to vector<8x2xi32>
    %13 = arith.cmpi slt, %9, %12 : vector<8x2xi32>
    %cst_6 = arith.constant -1.000000e+30 : f32
    %14 = vector.broadcast %cst_6 : f32 to vector<8x2xf32>
    %15 = arith.select %13, %5, %14 : vector<8x2xi1>, vector<8x2xf32>
    %cst_7 = arith.constant dense<0xFF800000> : vector<2xf32>
    %16 = vector.multi_reduction <maximumf>, %15, %cst_7 [0] : vector<8x2xf32> to vector<2xf32>
    %17 = vector.shape_cast %16 : vector<2xf32> to vector<1x2xf32>
    %18 = vector.broadcast %17 : vector<1x2xf32> to vector<8x2xf32>
    %19 = arith.subf %15, %18 : vector<8x2xf32>
    %20 = math.exp %19 : vector<8x2xf32>
    %cst_8 = arith.constant dense<0.000000e+00> : vector<2xf32>
    %21 = vector.multi_reduction <add>, %20, %cst_8 [0] : vector<8x2xf32> to vector<2xf32>
    %22 = vector.shape_cast %21 : vector<2xf32> to vector<1x2xf32>
    %23 = vector.broadcast %22 : vector<1x2xf32> to vector<8x2xf32>
    %24 = arith.divf %20, %23 : vector<8x2xf32>
    %25 = tpu.transpose %24, [1, 0] : vector<8x2xf32> -> vector<2x8xf32>
    %c0_9 = arith.constant 0 : index
    %c0_10 = arith.constant 0 : index
    %26 = vector.load %arg5[%c0_9, %c0_10] : memref<2x8xf32, #tpu.memory_space<vmem>>, vector<2x8xf32>
    tpu.vector_store %arg5[%c0_9, %c0_10], %25 {strides = array<i32>} : memref<2x8xf32, #tpu.memory_space<vmem>>, vector<2x8xf32>,
    %27 = vector.shape_cast %24 : vector<8x2xf32> to vector<8x2x1xf32>
    %28 = vector.broadcast %27 : vector<8x2x1xf32> to vector<8x2x32xf32>
    %29 = arith.mulf %0, %28 : vector<8x2x32xf32>
    %cst_11 = arith.constant dense<0.000000e+00> : vector<2x32xf32>
    %30 = vector.multi_reduction <add>, %29, %cst_11 [0] : vector<8x2x32xf32> to vector<2x32xf32>
    %c0_12 = arith.constant 0 : index
    %c0_13 = arith.constant 0 : index
    %31 = vector.load %arg6[%c0_12, %c0_13] : memref<2x32xf32, #tpu.memory_space<vmem>>, vector<2x32xf32>
    tpu.vector_store %arg6[%c0_12, %c0_13], %30 {strides = array<i32>} : memref<2x32xf32, #tpu.memory_space<vmem>>, vector<2x32xf32>,
    return
  }
  func.func @transform_0(%arg0: i32, %arg1: i32) -> (i32, i32, i32) {
    %c0_i32 = arith.constant 0 : i32
    %c0_i32_0 = arith.constant 0 : i32
    return %arg1, %arg0, %c0_i32 : i32, i32, i32
  }
  func.func @transform_1(%arg0: i32, %arg1: i32) -> (i32, i32) {
    %c0_i32 = arith.constant 0 : i32
    %c0_i32_0 = arith.constant 0 : i32
    %c0_i32_1 = arith.constant 0 : i32
    return %c0_i32, %c0_i32_0 : i32, i32
  }
  func.func @transform_2(%arg0: i32, %arg1: i32) -> (i32, i32) {
    %c0_i32 = arith.constant 0 : i32
    %c0_i32_0 = arith.constant 0 : i32
    return %arg0, %c0_i32 : i32, i32
  }
  func.func @transform_3(%arg0: i32, %arg1: i32) -> (i32, i32) {
    %c0_i32 = arith.constant 0 : i32
    %c0_i32_0 = arith.constant 0 : i32
    return %arg0, %c0_i32 : i32, i32
  }
  func.func @transform_4(%arg0: i32, %arg1: i32) -> (i32, i32) {
    %c0_i32 = arith.constant 0 : i32
    %c0_i32_0 = arith.constant 0 : i32
    return %arg0, %c0_i32 : i32, i32
  }
}

</mosaic_0001>

<bundles_post_ra>
// kernel: tpu_custom_call.1
= control target key start
LH: loop header
LB: loop body
LE: loop exit
PB: predicated region body
PF: predicated region fallthrough
CT: control target
= control target key end

     0   :  { %10 = vsyncpa [#allocation3], 0  ;;  %s528_s0 = inlined_call_operand.hbm [shape: f32[8,2,32], index: 0, kind: input, shape index: {}]   ;;  %s529_s1 = inlined_call_operand.vmem [shape: f32[1,32], index: 1, kind: input, shape index: {}]   ;;  %s530_s2 = inlined_call_operand.vmem [shape: s32[2,1], index: 2, kind: input, shape index: {}]   ;;  %s531_s3 = inlined_call_operand.hbm [shape: f32[2,8], index: 3, kind: output, shape index: {0}]   ;;  %s532_s4 = inlined_call_operand.hbm [shape: f32[2,32], index: 4, kind: output, shape index: {1}]  }
   0x1   :  { %11 = vsyncpa [#allocation4], 0 }
   0x2   :  { %12 = vsyncpa [#allocation7], 0  ;;  %s422_s15 = smov [#allocation2]  }
   0x3   :  { %s18_s16 = sshll.u32 %s422_s15, 4  ;;  %s19_s16 = int_to_ptr.vmem [resolvable:$true] %s18_s16 }
   0x4   :  { %s364_s17 = scalar_lea.vmem %s19_s16, 256  ;;  %p369_p1 = scmp.lt.s32.totalorder %s19_s16, %s19_s16 }
   0x5   :  { %p365_p0 = scmp.ne.s32.totalorder %s19_s16, %s364_s17  ;;  %p370_p2 = scmp.lt.s32.totalorder %s364_s17, %s364_s17 }
   0x7   :  { %p371_p3 = por %p370_p2, %p369_p1 }
   0x9   :  { %p372_p4 = pnand %p371_p3, %p365_p0 }
   0xb   :  { %375 = shalt.err (!%p372_p4)
}
   0xc   :  { %s423_s18 = smov 32   ;;  %s424_s19 = smov 2  }
   0xd   :  { %24 = dma.hbm_to_vmem [thread:$0]  %s528_s0, 256, %s19_s16, [#allocation3], %s423_s18, %s423_s18, %s424_s19  }
   0xe   :  { %416 = dma.done.wait [#allocation3], 256  }
   0xf   :  { %417 = vsyncadd [#allocation3], 4294967040  ;;  %vm55_vm0 = vcmask 254976   ;;  %v455_v0 = vld [vmem:[#allocation2] sm:$0x3]  ;;  %v81_v26 = vlaneseq  ;;  %vm165_vm1 = vcmask 1041409  }
  0x10   :  { %v344_v1 = vld [vmem:[%s529_s1] ss:$0 sm:$0xff]  ;;  %v460_v2 = vld [vmem:[#allocation2 + $0x4] sm:$0x3]  ;;  %v464_v5 = vld [vmem:[#allocation2 + $0x2] sm:$0x3] }
  0x11   :  { %v47_v3 = vmul.f32 %v344_v1, %v455_v0  ;;  %v49_v4 = vmul.f32 %v344_v1, %v460_v2  ;;  %v466_v6 = vld [vmem:[#allocation2 + $0x6] sm:$0x3]  ;;  %v48_v7 = vmul.f32 %v344_v1, %v464_v5  ;;  %v470_v9 = vld [vmem:[#allocation2 + $0x8] sm:$0x3]  ;;  %v472_v10 = vld [vmem:[#allocation2 + $0xa] sm:$0x3] }
  0x12   :  { %v50_v8 = vmul.f32 %v344_v1, %v466_v6  ;;  %v51_v15 = vmul.f32 %v344_v1, %v470_v9  ;;  %v52_v16 = vmul.f32 %v344_v1, %v472_v10  ;;  %v480_v17 = vld [vmem:[#allocation2 + $0xc] sm:$0x3]  ;;  %v482_v18 = vld [vmem:[#allocation2 + $0xe] sm:$0x3]  ;;  %v85_v25 = vld [vmem:[%s530_s2] sm:$0x3] }
  0x13   :  { %v56_v11 = vsel %vm55_vm0, %v47_v3, 0.0  ;;  %v62_v12 = vsel %vm55_vm0, %v49_v4, 0.0  ;;  %v59_v13 = vsel %vm55_vm0, %v48_v7, 0.0  ;;  %v53_v21 = vmul.f32 %v344_v1, %v480_v17  ;;  %s425_s2 = smov [#allocation5]  }
  0x14   :  { %57 = vadd.xlane.f32.xlu0 %v56_v11  ;;  %63 = vadd.xlane.f32.xlu1 %v62_v12  ;;  %v65_v14 = vsel %vm55_vm0, %v50_v8, 0.0  ;;  %v68_v19 = vsel %vm55_vm0, %v51_v15, 0.0  ;;  %v71_v20 = vsel %vm55_vm0, %v52_v16, 0.0  ;;  %v54_v22 = vmul.f32 %v344_v1, %v482_v18  ;;  %s321_s24 = sshll.u32 %s425_s2, 4  ;;  %s322_s24 = int_to_ptr.vmem [resolvable:$true] %s321_s24 }
  0x15   :  { %v74_v23 = vsel %vm55_vm0, %v53_v21, 0.0  ;;  %v493_v28 = vshrl.u32 %v81_v26, 7  ;;  %v132_v29 = vand.u32 127, %v81_v26  ;;  %vm167_vm2 = vcmask 1042434   ;;  %s376_s25 = scalar_lea.vmem %s322_s24, 32  ;;  %p381_p6 = scmp.lt.s32.totalorder %s322_s24, %s322_s24 }
  0x16   :  { %v77_v24 = vsel %vm55_vm0, %v54_v22, 0.0  ;;  %vm169_vm3 = vcmask 1043459   ;;  %vm171_vm4 = vcmask 1044484   ;;  %vm173_vm5 = vcmask 1045509   ;;  %p377_p5 = scmp.ne.s32.totalorder %s322_s24, %s376_s25  ;;  %p382_p7 = scmp.lt.s32.totalorder %s376_s25, %s376_s25 }
  0x17   :  { %v135_v32 = vsub.s32 %v132_v29, %v493_v28  ;;  %vm175_vm6 = vcmask 1046534   ;;  %v120_v49 = vsub.s32 0, %v493_v28  ;;  %vm177_vm7 = vcmask 1047559  }
  0x18   :  { %60 = vadd.xlane.f32.xlu0 %v59_v13  ;;  %66 = vadd.xlane.f32.xlu1 %v65_v14  ;;  %vm181_vm8 = vcmask 15360   ;;  %v244_v21 = vsub.s32 1, %v493_v28  ;;  %vm233_vm10 = vcmask 58368   ;;  %p383_p8 = por %p382_p7, %p381_p6 }
  0x1a   :  { %p384_p9 = pnand %p383_p8, %p377_p5 }
  0x1c   :  { %69 = vadd.xlane.f32.xlu0 %v68_v19  ;;  %72 = vadd.xlane.f32.xlu1 %v71_v20 }
  0x20   :  { %75 = vadd.xlane.f32.xlu0 %v74_v23  ;;  %78 = vadd.xlane.f32.xlu1 %v77_v24  ;;  %v251_v23 = vsub.s32 2, %v493_v28 }
  0x4d   :  { %86 = vxpose.xlu0.b32.start.end [1/1] (short) (narrow) %v85_v25, 8  ;;  %v258_v25 = vsub.s32 3, %v493_v28 }
  0x9d   :  { %v58_v27 = vpop.xlane.xlu0 %57  ;;  %v64_v30 = vpop.xlane.xlu1 %63 }
  0x9e   :  { %v136_v35 = vrot.slane %v58_v27, %v135_v32  ;;  %v144_v36 = vrot.slane %v64_v30, %v135_v32  ;;  %v265_v27 = vsub.s32 4, %v493_v28  ;;  %v272_v30 = vsub.s32 5, %v493_v28 }
  0xa1   :  { %v61_v31 = vpop.xlane.xlu0 %60  ;;  %v67_v34 = vpop.xlane.xlu1 %66 }
  0xa2   :  { %v140_v33 = vrot.slane %v61_v31, %v135_v32  ;;  %v148_v39 = vrot.slane %v67_v34, %v135_v32  ;;  %v286_v34 = vsub.s32 7, %v493_v28 }
  0xa4   :  { %v166_v37 = vsel %vm165_vm1, %v140_v33, %v136_v35 }
  0xa5   :  { %v70_v38 = vpop.xlane.xlu0 %69  ;;  %v168_v40 = vsel %vm167_vm2, %v144_v36, %v166_v37  ;;  %v73_v41 = vpop.xlane.xlu1 %72 }
  0xa6   :  { %v152_v42 = vrot.slane %v70_v38, %v135_v32  ;;  %v170_v43 = vsel %vm169_vm3, %v148_v39, %v168_v40  ;;  %v156_v45 = vrot.slane %v73_v41, %v135_v32 }
  0xa8   :  { %v172_v46 = vsel %vm171_vm4, %v152_v42, %v170_v43 }
  0xa9   :  { %v76_v44 = vpop.xlane.xlu0 %75  ;;  %v79_v48 = vpop.xlane.xlu1 %78  ;;  %v174_v50 = vsel %vm173_vm5, %v156_v45, %v172_v46 }
  0xaa   :  { %v160_v47 = vrot.slane %v76_v44, %v135_v32  ;;  %v164_v51 = vrot.slane %v79_v48, %v135_v32  ;;  %v279_v32 = vsub.s32 6, %v493_v28 }
  0xac   :  { %v176_v52 = vsel %vm175_vm6, %v160_v47, %v174_v50 }
  0xad   :  { %v178_v55 = vsel %vm177_vm7, %v164_v51, %v176_v52 }
  0xc9   :  { %v102_v53 = vpop.trf.xlu0 }
  0xca   :  { %v121_v54 = vrot.slane %v102_v53, %v120_v49 }
  0xcc   :  { %vm122_vm9 = vcmp.lt.s32.totalorder %v493_v28, %v121_v54 }
  0xcd   :  { %v180_v56 = vsel %vm122_vm9, %v178_v55, -1e+30 }
  0xce   :  { %v182_v57 = vsel %vm181_vm8, %v180_v56, -inf }
  0xcf   :  { %v183_v58 = vrot.slane %v182_v57, 4 }
  0xd1   :  { %v184_v59 = vmax.f32 %v182_v57, %v183_v58 }
  0xd3   :  { %v185_v60 = vrot.slane %v184_v59, 2 }
  0xd5   :  { %v186_v61 = vmax.f32 %v184_v59, %v185_v60 }
  0xd7   :  { %v187_v62 = vrot.slane %v186_v61, 1 }
  0xd9   :  { %v188_v63 = vmax.f32 %v186_v61, %v187_v62 }
  0xdb   :  { %v189_v1 = vsub.f32 %v180_v56, %v188_v63 }
  0xdd   :  { %v190_v3 = vmul.f32 1.442695, %v189_v1 }
  0xdf   :  { %352 = vpow2.f32 %v190_v3 }
  0xec   :  { %v353_v4 = vpop.eup %352 }
  0xed   :  { %v192_v7 = vsel %vm181_vm8, %v353_v4, 0.0 }
  0xee   :  { %v193_v8 = vrot.slane %v192_v7, 4 }
  0xf0   :  { %v194_v11 = vadd.f32 %v193_v8, %v192_v7 }
  0xf2   :  { %v195_v12 = vrot.slane %v194_v11, 2 }
  0xf4   :  { %v196_v13 = vadd.f32 %v195_v12, %v194_v11 }
  0xf6   :  { %v197_v14 = vrot.slane %v196_v13, 1 }
  0xf8   :  { %v198_v15 = vadd.f32 %v197_v14, %v196_v13 }
  0xfa   :  { %354 = vrcp.f32 %v198_v15 }
 0x107   :  { %v355_v16 = vpop.eup %354 }
 0x108   :  { %v200_v19 = vmul.f32 %v355_v16, %v353_v4 }
 0x10a   :  { %201 = vxpose.xlu0.b32.start.end [1/1] (short) (narrow) %v200_v19, 8  ;;  %v238_v20 = vrot.slane %v200_v19, %v120_v49  ;;  %v245_v22 = vrot.slane %v200_v19, %v244_v21  ;;  %v252_v24 = vrot.slane %v200_v19, %v251_v23  ;;  %v259_v26 = vrot.slane %v200_v19, %v258_v25 }
 0x10b   :  { %v266_v29 = vrot.slane %v200_v19, %v265_v27  ;;  %v273_v31 = vrot.slane %v200_v19, %v272_v30  ;;  %v280_v33 = vrot.slane %v200_v19, %v279_v32  ;;  %v287_v35 = vrot.slane %v200_v19, %v286_v34 }
 0x10c   :  { %240 = vbcast.lane.b32.xlu1 %v238_v20, 256 }
 0x110   :  { %247 = vbcast.lane.b32.xlu1 %v245_v22, 256 }
 0x114   :  { %254 = vbcast.lane.b32.xlu1 %v252_v24, 256 }
 0x118   :  { %261 = vbcast.lane.b32.xlu1 %v259_v26, 256 }
 0x11c   :  { %268 = vbcast.lane.b32.xlu1 %v266_v29, 256 }
 0x120   :  { %275 = vbcast.lane.b32.xlu1 %v273_v31, 256 }
 0x124   :  { %282 = vbcast.lane.b32.xlu1 %v280_v33, 256 }
 0x128   :  { %289 = vbcast.lane.b32.xlu1 %v287_v35, 256 }
 0x17e   :  { %v241_v36 = vpop.permute.xlu1 %240 }
 0x182   :  { %v248_v37 = vpop.permute.xlu1 %247 }
 0x186   :  { %v255_v38 = vpop.permute.xlu1 %254  ;;  %v217_v39 = vpop.trf.xlu0 }
 0x187   :  { %234 = vst.msk [vmem:[#allocation5] sm:$0x3] %vm233_vm10, %v217_v39 }
 0x188   :  { %387 = shalt.err (!%p384_p9)
}
 0x189   :  { %324 = dma.vmem_to_hbm [thread:$0]  %s322_s24, 32, %s531_s3, [#allocation4]   ;;  %v292_v40 = vmul.f32 %v248_v37, %v464_v5  ;;  %v291_v41 = vmul.f32 %v241_v36, %v455_v0  ;;  %v293_v42 = vmul.f32 %v255_v38, %v460_v2 }
 0x18a   :  { %v262_v28 = vpop.permute.xlu1 %261  ;;  %s426_s3 = smov [#allocation6]  }
 0x18b   :  { %v300_v44 = vsel %vm55_vm0, %v292_v40, 0.0  ;;  %v294_v45 = vmul.f32 %v262_v28, %v466_v6  ;;  %v299_v46 = vsel %vm55_vm0, %v291_v41, 0.0  ;;  %v302_v47 = vsel %vm55_vm0, %v293_v42, 0.0  ;;  %s331_s28 = sshll.u32 %s426_s3, 4  ;;  %s332_s28 = int_to_ptr.vmem [resolvable:$true] %s331_s28 }
 0x18c   :  { %v301_v49 = vadd.f32 %v300_v44, %v299_v46  ;;  %s396_s29 = scalar_lea.vmem %s332_s28, 32  ;;  %p401_p11 = scmp.lt.s32.totalorder %s332_s28, %s332_s28 }
 0x18d   :  { %v304_v51 = vsel %vm55_vm0, %v294_v45, 0.0  ;;  %p397_p10 = scmp.ne.s32.totalorder %s332_s28, %s396_s29  ;;  %p402_p12 = scmp.lt.s32.totalorder %s396_s29, %s396_s29 }
 0x18e   :  { %v269_v43 = vpop.permute.xlu1 %268  ;;  %v303_v0 = vadd.f32 %v302_v47, %v301_v49 }
 0x18f   :  { %v295_v48 = vmul.f32 %v269_v43, %v470_v9  ;;  %p403_p13 = por %p402_p12, %p401_p11 }
 0x190   :  { %v305_v52 = vadd.f32 %v304_v51, %v303_v0 }
 0x191   :  { %v306_v2 = vsel %vm55_vm0, %v295_v48, 0.0  ;;  %p404_p0 = pnand %p403_p13, %p397_p10 }
 0x192   :  { %v276_v50 = vpop.permute.xlu1 %275  ;;  %v307_v55 = vadd.f32 %v306_v2, %v305_v52 }
 0x193   :  { %v296_v5 = vmul.f32 %v276_v50, %v472_v10 }
 0x195   :  { %v308_v54 = vsel %vm55_vm0, %v296_v5, 0.0 }
 0x196   :  { %v283_v53 = vpop.permute.xlu1 %282  ;;  %v309_v57 = vadd.f32 %v308_v54, %v307_v55 }
 0x197   :  { %v297_v6 = vmul.f32 %v283_v53, %v480_v17 }
 0x199   :  { %v310_v56 = vsel %vm55_vm0, %v297_v6, 0.0 }
 0x19a   :  { %v290_v9 = vpop.permute.xlu1 %289  ;;  %v311_v59 = vadd.f32 %v310_v56, %v309_v57 }
 0x19b   :  { %v298_v58 = vmul.f32 %v290_v9, %v482_v18 }
 0x19d   :  { %v312_v10 = vsel %vm55_vm0, %v298_v58, 0.0 }
 0x19e   :  { %v313_v60 = vadd.f32 %v312_v10, %v311_v59 }
 0x1a0   :  { %314 = vst.msk [vmem:[#allocation6] sm:$0x3] %vm55_vm0, %v313_v60 }
 0x1a1   :  { %407 = shalt.err (!%p404_p0)
}
 0x1a2   :  { %334 = dma.vmem_to_hbm [thread:$0]  %s332_s28, 32, %s532_s4, [#allocation7]  }
 0x1a3   :  { %418 = dma.done.wait [#allocation4], 32  }
 0x1a4   :  { %419 = vsyncadd [#allocation4], 4294967264 }
 0x1a5   :  { %420 = dma.done.wait [#allocation7], 32  }
 0x1a6   :  { %421 = vsyncadd [#allocation7], 4294967264 }
 0x1a7   :  { %341 = vsyncpa [#allocation3], 1 }
 0x1a8   :  { %342 = vsyncpa [#allocation4], 1 }
 0x1a9   :  { %343 = vsyncpa [#allocation7], 1 }

</bundles_post_ra>
